<compile_context>
chip_gen: v7x
topology: tpu7x:2x2x1
jax: 0.10.0
libtpu: 0.0.40
codegen_flags: <defaults>
</compile_context>

<pallas_src>
import functools

import jax
import jax.numpy as jnp
from jax.experimental import pallas as pl
from jax.experimental.pallas import tpu as pltpu


def _round_up(x, m):
    return ((x + m - 1) // m) * m


def _edge_embed_kernel(attr_ref, neigh_ref, w_attr_ref, w_neigh_ref, b_ref, o_ref):
    # attr_ref, neigh_ref: (TM, C_in)
    # w_attr_ref, w_neigh_ref: (C_in, C_out)   -- resident across the grid
    # b_ref: (1, C_out), f32                   -- resident across the grid
    # o_ref: (TM, C_out)
    #
    # Fused concat:  cat([a, n], -1) @ W  ==  a @ W[:C_in] + n @ W[C_in:]
    acc = jnp.dot(attr_ref[...], w_attr_ref[...], preferred_element_type=jnp.float32)
    acc = acc + jnp.dot(neigh_ref[...], w_neigh_ref[...],
                        preferred_element_type=jnp.float32)
    acc = acc + b_ref[...]                       # broadcast (1, C_out) over rows
    o_ref[...] = jnp.maximum(acc, 0.0).astype(o_ref.dtype)   # act = ReLU


# Safe scoped-VMEM request on every generation (v5e default is only 16 MiB;
# v7x physical VMEM is 64 MiB per TC) plus a pipeline budget with headroom.
_VMEM_LIMIT_BYTES = 32 * 1024 * 1024
_VMEM_PIPELINE_BUDGET = 24 * 1024 * 1024


def _edge_embedding_pallas(attr, neigh_agg, weight, bias, *, tm=2048):
    """attr, neigh_agg: (bsz, N, C_in); weight: (C_out, 2*C_in); bias: (C_out,)."""
    bsz, n, c_in = attr.shape
    c_out = weight.shape[0]
    m = bsz * n
    dtype = attr.dtype

    # Flatten batch/node dims only; no concat, no extra HBM round trip.
    attr_flat = attr.reshape(m, c_in)
    neigh_flat = neigh_agg.reshape(m, c_in)

    # Weight prep (transpose/cast/split).  Cheap; under jit these fuse with the
    # launch.  For latency-critical serving, precompute w_attr/w_neigh/b2 once.
    w = weight.astype(dtype).T                  # (2*C_in, C_out)
    w_attr = w[:c_in]                           # (C_in, C_out)
    w_neigh = w[c_in:]                          # (C_in, C_out)
    b2 = bias.astype(jnp.float32).reshape(1, c_out)

    # Row-tile selection:
    #  * VMEM cap: each (TM, C_in)/(TM, C_out) tile is lane-padded to 128 in VMEM
    #    and double-buffered -> ~2*4*(128 + 128 + round_up(c_out,128)) bytes/row.
    #  * >= 2 grid steps whenever possible so v7x's two TensorCores both get work.
    #  * Multiple of 8 (f32 sublane), never larger than the (padded) row count.
    bytes_per_row = 2 * 4 * (128 + 128 + _round_up(c_out, 128))
    tm_vmem_cap = max(8, (_VMEM_PIPELINE_BUDGET // bytes_per_row) // 8 * 8)
    tm_two_core = _round_up(pl.cdiv(m, 2), 8)
    tm_eff = max(8, min(tm, tm_vmem_cap, tm_two_core, _round_up(m, 8)))
    grid_m = pl.cdiv(m, tm_eff)

    cost = pl.CostEstimate(
        flops=2 * m * (2 * c_in) * c_out,
        transcendentals=0,
        bytes_accessed=4 * (2 * m * c_in          # attr + neigh reads
                            + 2 * c_in * c_out    # weights
                            + c_out               # bias
                            + m * c_out),         # output write
    )

    out = pl.pallas_call(
        _edge_embed_kernel,
        out_shape=jax.ShapeDtypeStruct((m, c_out), dtype),
        grid_spec=pl.GridSpec(
            grid=(grid_m,),
            in_specs=[
                pl.BlockSpec((tm_eff, c_in), lambda i: (i, 0)),    # attr rows
                pl.BlockSpec((tm_eff, c_in), lambda i: (i, 0)),    # neigh rows
                pl.BlockSpec((c_in, c_out), lambda i: (0, 0)),     # W_attr (resident)
                pl.BlockSpec((c_in, c_out), lambda i: (0, 0)),     # W_neigh (resident)
                pl.BlockSpec((1, c_out), lambda i: (0, 0)),        # bias (resident)
            ],
            out_specs=pl.BlockSpec((tm_eff, c_out), lambda i: (i, 0)),
        ),
        compiler_params=pltpu.CompilerParams(
            dimension_semantics=("parallel",),     # independent rows -> megacore shard
            vmem_limit_bytes=_VMEM_LIMIT_BYTES,
        ),
        cost_estimate=cost,
    )(attr_flat, neigh_flat, w_attr, w_neigh, b2)

    return out.reshape(bsz, n, c_out)


def edge_embedding_f3_4(attr, neigh_agg, weight, bias, *, tm=2048,
                        min_rows_for_pallas=4096, force_pallas=False):
    """Forward of EdgeEmbedding_F3_4: ReLU(Linear_{2*C_in -> C_out}(cat([attr, neigh])))."""
    # TODO(synk): act_func is a runtime-supplied callable in the PyTorch module;
    # ReLU is assumed here.
    m = attr.shape[0] * attr.shape[1]
    if force_pallas or m >= min_rows_for_pallas:
        return _edge_embedding_pallas(attr, neigh_agg, weight, bias, tm=tm)
    # Tiny problems: per-pallas_call / per-grid-step overhead dwarfs the work;
    # let XLA fuse matmul + bias + ReLU.
    x = jnp.concatenate([attr, neigh_agg], axis=-1)
    return jnp.maximum(jnp.einsum("bnk,ok->bno", x, weight) + bias, 0.0)


if __name__ == "__main__":
    # Small shapes consistent with the module.
    bsz, n_nodes, c_in, c_out = 2, 8, 4, 32

    key = jax.random.PRNGKey(0)
    k_attr, k_neigh, k_w, k_b = jax.random.split(key, 4)

    attr = jax.random.normal(k_attr, (bsz, n_nodes, c_in), dtype=jnp.float32)
    neigh_agg = jax.random.normal(k_neigh, (bsz, n_nodes, c_in), dtype=jnp.float32)

    # "Linear(2*C_in, C_out)" params (PyTorch stores weight as (out, in)).
    weight = jax.random.normal(k_w, (c_out, 2 * c_in), dtype=jnp.float32) * 0.1
    bias = jax.random.normal(k_b, (c_out,), dtype=jnp.float32) * 0.1

    # Jit the whole wrapper so the weight transpose/split prep fuses with the
    # kernel launch; force the Pallas path so the kernel is exercised at tiny shapes.
    fwd = jax.jit(functools.partial(edge_embedding_f3_4, force_pallas=True))
    out = jax.block_until_ready(fwd(attr, neigh_agg, weight, bias))

    # Reference check in plain JAX.
    x_ref = jnp.concatenate([attr, neigh_agg], axis=2)
    ref = jnp.maximum(jnp.einsum("bnk,ok->bno", x_ref, weight) + bias, 0.0)
    assert out.shape == (bsz, n_nodes, c_out)
    assert jnp.allclose(out, ref, atol=1e-5, rtol=1e-5), float(jnp.max(jnp.abs(out - ref)))

    print("KERNEL_OK")
</pallas_src>

<mosaic_0001>
module attributes {stable_mosaic.version = 11 : i64} {
  func.func @_edge_embed_kernel(%arg0: i32, %arg1: memref<8x4xf32, #tpu.memory_space<vmem>>, %arg2: memref<8x4xf32, #tpu.memory_space<vmem>>, %arg3: memref<4x32xf32, #tpu.memory_space<vmem>>, %arg4: memref<4x32xf32, #tpu.memory_space<vmem>>, %arg5: memref<1x32xf32, #tpu.memory_space<vmem>>, %arg6: memref<8x32xf32, #tpu.memory_space<vmem>>) attributes {dimension_semantics = [#tpu.dimension_semantics<parallel>], iteration_bounds = array<i64: 2>, scalar_prefetch = 0 : i64, scratch_operands = 0 : i64, tpu.core_type = #tpu.core_type<tc>, window_params = [{transform_indices = @transform_0, window_bounds = array<i64: 8, 4>}, {transform_indices = @transform_1, window_bounds = array<i64: 8, 4>}, {pipeline_mode = #tpu.pipeline_mode<synchronous>, transform_indices = @transform_2, window_bounds = array<i64: 4, 32>}, {pipeline_mode = #tpu.pipeline_mode<synchronous>, transform_indices = @transform_3, window_bounds = array<i64: 4, 32>}, {pipeline_mode = #tpu.pipeline_mode<synchronous>, transform_indices = @transform_4, window_bounds = array<i64: 1, 32>}, {transform_indices = @transform_5, window_bounds = array<i64: 8, 32>}]} {
    %c0 = arith.constant 0 : index
    %c0_0 = arith.constant 0 : index
    %0 = vector.load %arg1[%c0, %c0_0] : memref<8x4xf32, #tpu.memory_space<vmem>>, vector<8x4xf32>
    %c0_1 = arith.constant 0 : index
    %c0_2 = arith.constant 0 : index
    %1 = vector.load %arg3[%c0_1, %c0_2] : memref<4x32xf32, #tpu.memory_space<vmem>>, vector<4x32xf32>
    %cst = arith.constant dense<0.000000e+00> : vector<8x32xf32>
    %2 = tpu.matmul %0, %1, %cst {dimension_numbers = #tpu.dot_dimension_numbers<[1], [0], [0], [1], [0, 0, 1, 1], [], []>} : vector<8x4xf32>, vector<4x32xf32>, vector<8x32xf32> -> vector<8x32xf32>
    %c0_3 = arith.constant 0 : index
    %c0_4 = arith.constant 0 : index
    %3 = vector.load %arg2[%c0_3, %c0_4] : memref<8x4xf32, #tpu.memory_space<vmem>>, vector<8x4xf32>
    %c0_5 = arith.constant 0 : index
    %c0_6 = arith.constant 0 : index
    %4 = vector.load %arg4[%c0_5, %c0_6] : memref<4x32xf32, #tpu.memory_space<vmem>>, vector<4x32xf32>
    %cst_7 = arith.constant dense<0.000000e+00> : vector<8x32xf32>
    %5 = tpu.matmul %3, %4, %cst_7 {dimension_numbers = #tpu.dot_dimension_numbers<[1], [0], [0], [1], [0, 0, 1, 1], [], []>} : vector<8x4xf32>, vector<4x32xf32>, vector<8x32xf32> -> vector<8x32xf32>
    %6 = arith.addf %2, %5 : vector<8x32xf32>
    %c0_8 = arith.constant 0 : index
    %c0_9 = arith.constant 0 : index
    %7 = vector.load %arg5[%c0_8, %c0_9] : memref<1x32xf32, #tpu.memory_space<vmem>>, vector<1x32xf32>
    %8 = vector.broadcast %7 : vector<1x32xf32> to vector<8x32xf32>
    %9 = arith.addf %6, %8 : vector<8x32xf32>
    %cst_10 = arith.constant 0.000000e+00 : f32
    %10 = vector.broadcast %cst_10 : f32 to vector<8x32xf32>
    %11 = arith.maximumf %9, %10 : vector<8x32xf32>
    %c0_11 = arith.constant 0 : index
    %c0_12 = arith.constant 0 : index
    %12 = vector.load %arg6[%c0_11, %c0_12] : memref<8x32xf32, #tpu.memory_space<vmem>>, vector<8x32xf32>
    tpu.vector_store %arg6[%c0_11, %c0_12], %11 {strides = array<i32>} : memref<8x32xf32, #tpu.memory_space<vmem>>, vector<8x32xf32>,
    return
  }
  func.func @transform_0(%arg0: i32) -> (i32, i32) {
    %c0_i32 = arith.constant 0 : i32
    %c0_i32_0 = arith.constant 0 : i32
    return %arg0, %c0_i32 : i32, i32
  }
  func.func @transform_1(%arg0: i32) -> (i32, i32) {
    %c0_i32 = arith.constant 0 : i32
    %c0_i32_0 = arith.constant 0 : i32
    return %arg0, %c0_i32 : i32, i32
  }
  func.func @transform_2(%arg0: i32) -> (i32, i32) {
    %c0_i32 = arith.constant 0 : i32
    %c0_i32_0 = arith.constant 0 : i32
    %c0_i32_1 = arith.constant 0 : i32
    return %c0_i32, %c0_i32_0 : i32, i32
  }
  func.func @transform_3(%arg0: i32) -> (i32, i32) {
    %c0_i32 = arith.constant 0 : i32
    %c0_i32_0 = arith.constant 0 : i32
    %c0_i32_1 = arith.constant 0 : i32
    return %c0_i32, %c0_i32_0 : i32, i32
  }
  func.func @transform_4(%arg0: i32) -> (i32, i32) {
    %c0_i32 = arith.constant 0 : i32
    %c0_i32_0 = arith.constant 0 : i32
    %c0_i32_1 = arith.constant 0 : i32
    return %c0_i32, %c0_i32_0 : i32, i32
  }
  func.func @transform_5(%arg0: i32) -> (i32, i32) {
    %c0_i32 = arith.constant 0 : i32
    %c0_i32_0 = arith.constant 0 : i32
    return %arg0, %c0_i32 : i32, i32
  }
}

</mosaic_0001>

<bundles_post_ra>
// kernel: edge_embedding_f3_4.1
= control target key start
LH: loop header
LB: loop body
LE: loop exit
PB: predicated region body
PF: predicated region fallthrough
CT: control target
= control target key end

     0   :  { %10 = vsyncpa [#allocation3], 0  ;;  %s771_s0 = inlined_call_operand.vmem [shape: f32[16,4], index: 0, kind: input, shape index: {}]   ;;  %s772_s1 = inlined_call_operand.vmem [shape: f32[16,4], index: 1, kind: input, shape index: {}]   ;;  %s773_s2 = inlined_call_operand.vmem [shape: f32[4,32], index: 2, kind: input, shape index: {}]   ;;  %s774_s3 = inlined_call_operand.vmem [shape: f32[4,32], index: 3, kind: input, shape index: {}]   ;;  %s775_s4 = inlined_call_operand.vmem [shape: f32[1,32], index: 4, kind: input, shape index: {}]   ;;  %s776_s5 = inlined_call_operand.hbm [shape: f32[16,32], index: 5, kind: output, shape index: {}]  }
   0x1   :  { %12 = vsyncpa [#allocation3 + $0x1], 0  ;;  %s659_s18 = smov 0   ;;  %s661_s19 = smov 0  }
   0x2   :  { %s663_s20 = smov 0   ;;  %s665_s21 = smov 0  }
   0x3 LB: > { %s680_s22 = sadd.s32 4294967295, %s624_s21   ;;  %s491_s23 = sadd.s32 4294967294, %s624_s21   ;;  %s624_s21 = sphi %s665_s21, %s782_s21   ;;  %s620_s20 = sphi %s663_s20, %s781_s20   ;;  %s616_s19 = sphi %s661_s19, %s780_s19   ;;  %s612_s18 = sphi %s659_s18, %s779_s18  }
   0x4   : > { %s684_s24 = sadd.s32 1, %s624_s21   ;;  %s140_s25 = sadd.s32 1, %s620_s20 }
   0x5   : > { %s137_s26 = ssub.s32 %s624_s21, %s684_s24  ;;  %p150_p0 = scmp.ne.s32.totalorder %s620_s20, %s616_s19 }
   0x6   : > { %p138_p1 = scmp.eq.s32.totalorder %s137_s26, 0  ;;  %p151_p2 = scmp.eq.s32.totalorder %s680_s22, 1 }
   0x7   : > { %p156_p3 = scmp.ne.s32.totalorder %s616_s19, %s612_s18  ;;  %p157_p4 = scmp.eq.s32.totalorder %s491_s23, 1 }
   0x8   : > { %s695_s27 = scalar_select %p138_p1, %s620_s20, %s140_s25  }
   0x9   : > { %p697_p5 = por %p151_p2, %p150_p0  ;;  %p701_p6 = por %p157_p4, %p156_p3 }
   0xa   : > { %p494_p7 = scmp.ge.s32.totalorder %s624_s21, 1  ;;  %p198_p8 = scmp.lt.s32.totalorder %s624_s21, 3 }
   0xc   : > { %p199_p9 = pnand %p494_p7, %p198_p8 }
   0xd   : > { %v240_v0 = vld [vmem:[%s774_s3] sm:$0xf] (!%p199_p9)  ;;  %vm245_vm0 = vcmask (!%p199_p9), 1043456   ;;  %p229_p10 = scmp.lt.s32.totalorder (!%p199_p9), %s680_s22, 1  ;;  %v626_v1 = vmov (!%p199_p9), 0.0   ;;  %vm627_vm1 = vmmov (!%p199_p9), 0  }
   0xe   : > { %202 = sbr.rel (%p199_p9) target bundleno = 259 (0x103), region = 40  ;;  %511 = vmatprep.subr.mxu0 (!%p199_p9), %v626_v1  ;;  %516 = vmatprep.subr.mxu1 (!%p199_p9), %v626_v1  ;;  %v238_v2 = vld [vmem:[%s773_s2] sm:$0xf] (!%p199_p9)  ;;  %vm241_vm2 = vcmask (!%p199_p9), 31744   ;;  %s226_s17 = sand.u32 (!%p199_p9), 1, %s616_s19   ;;  %vm404_vm3 = vcmask (!%p199_p9), 261120  }
   0xf   : > { %512 = vmatpush3.msk.msra.mxu0 (!%p199_p9), %vm245_vm0, %v240_v0  ;;  %513 = vmatprep.mubr.msk.f32.mxu0 (!%p199_p9), %vm627_vm1, %v626_v1  ;;  %s495_s23 = sshll.u32 (!%p199_p9), %s226_s17, 3  ;;  %v502_v7 = vld [vmem:[%s775_s4] ss:$0 sm:$0xff] (!%p199_p9)  ;;  %s504_s30 = sshll.u32 (!%p199_p9), %s680_s22, 7 }
  0x10   : > { %517 = vmatpush3.msk.msra.mxu1 (!%p199_p9), %vm245_vm0, %v238_v2  ;;  %518 = vmatprep.mubr.msk.f32.mxu1 (!%p199_p9), %vm627_vm1, %v626_v1  ;;  %s228_s6 = scalar_lea.vmem (!%p199_p9), [#allocation2], %s495_s23  ;;  %s407_s11 = scalar_lea.sflag (!%p199_p9), [#allocation3], %s226_s17 }
  0x11   : > { %s420_s7 = sshll.u32 (!%p199_p9), %s228_s6, 4  ;;  %s731_s7 = int_to_ptr.vmem [resolvable:$true] %s420_s7 }
  0x12   : > { %s562_s12 = scalar_lea.vmem (!%p199_p9), %s731_s7, 128 }
  0x13   : > { %p563_p11 = scmp.ne.s32.totalorder (!%p199_p9), %s731_s7, %s562_s12 }
  0x15   : > { %s230_s9 = scalar_select %p229_p10, %s680_s22, 1 }
  0x16   : > { %p564_p12 = pnand %p563_p11, %p697_p5  ;;  %s628_s22 = smov [#allocation2]  }
  0x17   : > { %s496_s10 = sshll.u32 %s230_s9, 3 }
  0x18   : > { %s236_s13 = scalar_lea.vmem %s772_s1, %s496_s10  ;;  %s232_s16 = scalar_lea.vmem %s771_s0, %s496_s10 }
  0x19   : > { %v239_v3 = vld [vmem:[%s236_s13] sm:$0xff]  ;;  %s729_s10 = scalar_lea.hbm %s776_s5, %s504_s30  ;;  %p565_p13 = pneg %p564_p12 }
  0x1a   : > { %v237_v4 = vld [vmem:[%s232_s16] sm:$0xff]  ;;  %514 = vmatmul.mubr.msk.f32.vlgmr.msra.gmra.mrb[0].mxu0 %vm241_vm2, %v239_v3  ;;  %s566_s13 = sshll.u32 %s628_s22, 4  ;;  %s567_s13 = int_to_ptr.vmem [resolvable:$false] %s566_s13 }
  0x1b   : > { %519 = vmatmul.mubr.msk.f32.vlgmr.msra.gmra.mrb[0].mxu1 %vm241_vm2, %v237_v4  ;;  %s568_s14 = scalar_lea.vmem %s567_s13, 256  ;;  %p569_p0 = scmp.lt.s32.totalorder %s731_s7, %s567_s13 }
  0x1c   : > { %p570_p1 = scmp.lt.s32.totalorder %s568_s14, %s562_s12 }
  0x1e   : > { %p571_p2 = por %p570_p1, %p569_p0 }
  0x20   : > { %p572_p3 = pnand %p571_p2, %p565_p13 }
  0xed   : > { %v315_v5 = vpop.f32.mrb[0].mxu0 }
  0xee   : > { %v391_v6 = vpop.f32.mrb[0].mxu1  ;;  %v515_v9 = vpop.f32.mrb[1].mxu0 }
  0xef   : > { %v392_v8 = vadd.f32 %v391_v6, %v315_v5  ;;  %v520_v10 = vpop.f32.mrb[1].mxu1 }
  0xf1   : > { %v402_v11 = vadd.f32 %v502_v7, %v392_v8 }
  0xf3   : > { %v403_v12 = vmax.f32 %v402_v11, 0.0 }
  0xf5   : > { %405 = vst.msk [vmem:[%s228_s6] sm:$0xff] %vm404_vm3, %v403_v12 }
  0xf6   : > { %575 = shalt.err (!%p572_p3)
}
  0xf7   : > { %s576_s15 = scalar_lea.hbm %s729_s10, 128  ;;  %s580_s23 = scalar_lea.hbm %s776_s5, 256 }
  0xf8   : > { %p577_p4 = scmp.ne.s32.totalorder %s729_s10, %s576_s15  ;;  %p581_p9 = scmp.lt.u32.totalorder %s729_s10, %s776_s5 }
  0xf9   : > { %p582_p10 = scmp.lt.u32.totalorder %s580_s23, %s576_s15  ;;  %p584_p12 = scmp.lt.u32.totalorder %s576_s15, %s729_s10 }
  0xfa   : > { %p578_p7 = pnand %p577_p4, %p697_p5 }
  0xfb   : > { %p583_p11 = por %p582_p10, %p581_p9 }
  0xfc   : > { %p579_p8 = pneg %p578_p7 }
  0xfd   : > { %p585_p13 = por %p584_p12, %p583_p11 }
  0xff   : > { %p586_p0 = pnand %p585_p13, %p579_p8 }
 0x101   : > { %589 = shalt.err (!%p586_p0)
}
 0x102   : > { %521 = dma.vmem_to_hbm [thread:$0]  (%p697_p5), %s731_s7, 128, %s729_s10, %s407_s11  }
 0x103 PF: > { %p527_p1 = scmp.ge.s32.totalorder %s624_s21, 2  ;;  %s432_s30 = sand.u32 1, %s612_s18  }
 0x104   : > { %s433_s6 = scalar_lea.sflag [#allocation3], %s432_s30 }
 0x105   : > { %p524_p2 = pnand %p527_p1, %p701_p6 }
 0x107   : > { %607 = dma.done.wait (!%p524_p2), %s433_s6, 128  }
 0x108   : > { %609 = vsyncadd (!%p524_p2), %s433_s6, 4294967168  ;;  %p15_p3 = scmp.ge.s32.totalorder %s684_s24, 4   ;;  %s779_s18 = smov %s616_s19 }
 0x109   : > { %s780_s19 = smov %s620_s20  ;;  %s781_s20 = smov %s695_s27 }
 0x10a   : > { %s782_s21 = smov %s684_s24  ;;  %17 = sbr.rel (!%p15_p3) target bundleno = 3 (0x3), region = 78 }
 0x111   :  { %438 = vsyncpa [#allocation3], 1 }
 0x112   :  { %440 = vsyncpa [#allocation3 + $0x1], 1 }

</bundles_post_ra>
